<compile_context>
chip_gen: v7x
topology: tpu7x:2x2x1
jax: 0.10.0
libtpu: 0.0.40
codegen_flags: <defaults>
</compile_context>

<pallas_src>
import jax
import jax.numpy as jnp
from jax.experimental import pallas as pl
from jax.experimental.pallas import tpu as pltpu

# ----- hyperparameters (small, consistent with the module) -----
N_CLASSES   = 8
LATENT_DIM  = 32
IMG_SIZE    = 16
CHANNELS    = 1
IMG_PROD    = CHANNELS * IMG_SIZE * IMG_SIZE     # 256
IN_DIM      = LATENT_DIM + N_CLASSES             # 40
H1, H2      = 256, 512
BN_EPS      = 0.8                                # nn.BatchNorm1d(dim, 0.8) -> eps=0.8
LRELU_SLOPE = 0.2


def _bn_lrelu(h, gamma, beta, eps):
    """Training-mode BatchNorm1d folded to one scale/shift, fused with LeakyReLU(0.2).

    One pass over h for the stats (sum and sum of squares share the reduction pass),
    then a single fused multiply-add per element.  rsqrt goes to the EUP slot.
    """
    inv_n = 1.0 / h.shape[0]
    s1 = jnp.sum(h, axis=0, keepdims=True)
    s2 = jnp.sum(h * h, axis=0, keepdims=True)
    mu = s1 * inv_n
    var = s2 * inv_n - mu * mu                   # biased batch variance
    scale = gamma * jax.lax.rsqrt(var + eps)
    shift = beta - mu * scale
    y = h * scale + shift
    return jnp.where(y > 0, y, LRELU_SLOPE * y)


def generator_kernel(labels_ref, emb_ref, z_ref,
                     w1e_ref, w1z_ref, g1_ref, be1_ref,
                     w2_ref, g2_ref, be2_ref,
                     w3_ref, b3_ref,
                     out_ref):
    B = out_ref.shape[0]

    # --- fused embedding lookup: one_hot(labels) @ label_emb (exact gather) ---
    labels = labels_ref[...]                                          # (B, 1) int32
    classes = jax.lax.broadcasted_iota(jnp.int32, (B, N_CLASSES), 1)  # (B, NC)
    onehot = (labels == classes).astype(jnp.float32)
    emb = jnp.dot(onehot, emb_ref[...],
                  preferred_element_type=jnp.float32)                 # (B, NC) exact rows

    # --- block 1: Linear(IN_DIM, 256) + BN + LeakyReLU ---
    # [emb, z] @ W1  ==  emb @ W1[:NC] + z @ W1[NC:]   (bias cancelled by BN)
    h = (jnp.dot(emb.astype(jnp.bfloat16), w1e_ref[...],
                 preferred_element_type=jnp.float32)
         + jnp.dot(z_ref[...].astype(jnp.bfloat16), w1z_ref[...],
                   preferred_element_type=jnp.float32))               # (B, H1) f32
    h = _bn_lrelu(h, g1_ref[...], be1_ref[...], BN_EPS)

    # --- block 2: Linear(256, 512) + BN + LeakyReLU ---
    h = jnp.dot(h.astype(jnp.bfloat16), w2_ref[...],
                preferred_element_type=jnp.float32)                   # (B, H2) f32
    h = _bn_lrelu(h, g2_ref[...], be2_ref[...], BN_EPS)

    # --- block 3: Linear(512, IMG_PROD) + bias + Tanh ---
    h = jnp.dot(h.astype(jnp.bfloat16), w3_ref[...],
                preferred_element_type=jnp.float32) + b3_ref[...]
    out_ref[...] = jnp.tanh(h)                                        # lane-dense (B, 256)


def _cost_estimate(B):
    flops = 2 * B * (N_CLASSES * N_CLASSES
                     + N_CLASSES * H1 + LATENT_DIM * H1
                     + H1 * H2 + H2 * IMG_PROD)
    transcendentals = B * IMG_PROD + H1 + H2          # tanh + rsqrt
    bytes_accessed = (
        2 * (IN_DIM * H1 + H1 * H2 + H2 * IMG_PROD)   # bf16 weights
        + 4 * (2 * (H1 + H2) + IMG_PROD)              # gamma/beta/b3 (f32)
        + 4 * N_CLASSES * N_CLASSES                   # embedding table
        + 4 * B * (LATENT_DIM + 1)                    # z + labels
        + 4 * B * IMG_PROD)                           # output
    return pl.CostEstimate(flops=flops,
                           transcendentals=transcendentals,
                           bytes_accessed=bytes_accessed)


def generator_forward(z, labels, params):
    """z: (B, LATENT_DIM) f32, labels: (B,) int32 -> (B, 1, IMG_SIZE, IMG_SIZE)."""
    B = z.shape[0]

    # weight-only prep (one-time, weight DMA halved by bf16 cast; b1/b2 dropped entirely)
    w1 = params["w1"]
    w1e = w1[:N_CLASSES].astype(jnp.bfloat16)          # (NC, H1)
    w1z = w1[N_CLASSES:].astype(jnp.bfloat16)          # (LATENT_DIM, H1)
    w2 = params["w2"].astype(jnp.bfloat16)
    w3 = params["w3"].astype(jnp.bfloat16)

    vmem = pl.BlockSpec(memory_space=pltpu.MemorySpace.VMEM)
    flat = pl.pallas_call(
        generator_kernel,
        out_shape=jax.ShapeDtypeStruct((B, IMG_PROD), jnp.float32),
        in_specs=[vmem] * 12,
        out_specs=vmem,
        cost_estimate=_cost_estimate(B),
    )(
        labels.reshape(B, 1).astype(jnp.int32),
        params["label_emb"],
        z,
        w1e, w1z, params["g1"], params["be1"],
        w2, params["g2"], params["be2"],
        w3, params["b3"],
    )

    # NCHW view only at the final consumer boundary (matches img.view(B, 1, H, W))
    return flat.reshape(B, CHANNELS, IMG_SIZE, IMG_SIZE)


generator_forward = jax.jit(generator_forward)


def init_params(key):
    ks = jax.random.split(key, 7)

    def linear(kw, fan_in, fan_out):
        bound = 1.0 / jnp.sqrt(fan_in)
        return jax.random.uniform(kw, (fan_in, fan_out), jnp.float32, -bound, bound)

    return {
        "label_emb": jax.random.normal(ks[0], (N_CLASSES, N_CLASSES), jnp.float32),
        "w1": linear(ks[1], IN_DIM, H1),
        # b1/b2 intentionally omitted: a Linear bias followed by training-mode BatchNorm
        # is exactly cancelled by the mean subtraction.
        "g1": jnp.ones((1, H1), jnp.float32),
        "be1": jnp.zeros((1, H1), jnp.float32),
        "w2": linear(ks[3], H1, H2),
        "g2": jnp.ones((1, H2), jnp.float32),
        "be2": jnp.zeros((1, H2), jnp.float32),
        "w3": linear(ks[5], H2, IMG_PROD),
        "b3": jax.random.uniform(ks[6], (1, IMG_PROD), jnp.float32, -0.1, 0.1),
    }


if __name__ == "__main__":
    key = jax.random.PRNGKey(0)
    k_p, k_z, k_l = jax.random.split(key, 3)

    B = 8
    params = init_params(k_p)
    z = jax.random.normal(k_z, (B, LATENT_DIM), jnp.float32)
    labels = jax.random.randint(k_l, (B,), 0, N_CLASSES, jnp.int32)

    img = generator_forward(z, labels, params)
    jax.block_until_ready(img)
    assert img.shape == (B, CHANNELS, IMG_SIZE, IMG_SIZE)
    assert bool(jnp.all(jnp.isfinite(img)))
    print("KERNEL_OK")
</pallas_src>

<mosaic_0001>
module attributes {stable_mosaic.version = 11 : i64} {
  func.func @generator_kernel(%arg0: memref<8x1xi32, #tpu.memory_space<vmem>>, %arg1: memref<8x8xf32, #tpu.memory_space<vmem>>, %arg2: memref<8x32xf32, #tpu.memory_space<vmem>>, %arg3: memref<8x256xbf16, #tpu.memory_space<vmem>>, %arg4: memref<32x256xbf16, #tpu.memory_space<vmem>>, %arg5: memref<1x256xf32, #tpu.memory_space<vmem>>, %arg6: memref<1x256xf32, #tpu.memory_space<vmem>>, %arg7: memref<256x512xbf16, #tpu.memory_space<vmem>>, %arg8: memref<1x512xf32, #tpu.memory_space<vmem>>, %arg9: memref<1x512xf32, #tpu.memory_space<vmem>>, %arg10: memref<512x256xbf16, #tpu.memory_space<vmem>>, %arg11: memref<1x256xf32, #tpu.memory_space<vmem>>, %arg12: memref<8x256xf32, #tpu.memory_space<vmem>>) attributes {dimension_semantics = [], scalar_prefetch = 0 : i64, scratch_operands = 0 : i64, tpu.core_type = #tpu.core_type<tc>} {
    %c0 = arith.constant 0 : index
    %c0_0 = arith.constant 0 : index
    %0 = vector.load %arg0[%c0, %c0_0] : memref<8x1xi32, #tpu.memory_space<vmem>>, vector<8x1xi32>
    %1 = tpu.iota {dimensions = array<i32: 1>} : vector<8x8xi32>
    %2 = vector.broadcast %0 : vector<8x1xi32> to vector<8x8xi32>
    %3 = arith.cmpi eq, %2, %1 : vector<8x8xi32>
    %4 = arith.extui %3 : vector<8x8xi1> to vector<8x8xi32>
    %5 = arith.sitofp %4 : vector<8x8xi32> to vector<8x8xf32>
    %c0_1 = arith.constant 0 : index
    %c0_2 = arith.constant 0 : index
    %6 = vector.load %arg1[%c0_1, %c0_2] : memref<8x8xf32, #tpu.memory_space<vmem>>, vector<8x8xf32>
    %cst = arith.constant dense<0.000000e+00> : vector<8x8xf32>
    %7 = tpu.matmul %5, %6, %cst {dimension_numbers = #tpu.dot_dimension_numbers<[1], [0], [0], [1], [0, 0, 1, 1], [], []>} : vector<8x8xf32>, vector<8x8xf32>, vector<8x8xf32> -> vector<8x8xf32>
    %8 = arith.truncf %7 : vector<8x8xf32> to vector<8x8xbf16>
    %c0_3 = arith.constant 0 : index
    %c0_4 = arith.constant 0 : index
    %9 = vector.load %arg3[%c0_3, %c0_4] : memref<8x256xbf16, #tpu.memory_space<vmem>>, vector<8x256xbf16>
    %cst_5 = arith.constant dense<0.000000e+00> : vector<8x256xf32>
    %10 = tpu.matmul %8, %9, %cst_5 {dimension_numbers = #tpu.dot_dimension_numbers<[1], [0], [0], [1], [0, 0, 1, 1], [], []>} : vector<8x8xbf16>, vector<8x256xbf16>, vector<8x256xf32> -> vector<8x256xf32>
    %c0_6 = arith.constant 0 : index
    %c0_7 = arith.constant 0 : index
    %11 = vector.load %arg2[%c0_6, %c0_7] : memref<8x32xf32, #tpu.memory_space<vmem>>, vector<8x32xf32>
    %12 = arith.truncf %11 : vector<8x32xf32> to vector<8x32xbf16>
    %c0_8 = arith.constant 0 : index
    %c0_9 = arith.constant 0 : index
    %13 = vector.load %arg4[%c0_8, %c0_9] : memref<32x256xbf16, #tpu.memory_space<vmem>>, vector<32x256xbf16>
    %cst_10 = arith.constant dense<0.000000e+00> : vector<8x256xf32>
    %14 = tpu.matmul %12, %13, %cst_10 {dimension_numbers = #tpu.dot_dimension_numbers<[1], [0], [0], [1], [0, 0, 1, 1], [], []>} : vector<8x32xbf16>, vector<32x256xbf16>, vector<8x256xf32> -> vector<8x256xf32>
    %15 = arith.addf %10, %14 : vector<8x256xf32>
    %c0_11 = arith.constant 0 : index
    %c0_12 = arith.constant 0 : index
    %16 = vector.load %arg5[%c0_11, %c0_12] : memref<1x256xf32, #tpu.memory_space<vmem>>, vector<1x256xf32>
    %c0_13 = arith.constant 0 : index
    %c0_14 = arith.constant 0 : index
    %17 = vector.load %arg6[%c0_13, %c0_14] : memref<1x256xf32, #tpu.memory_space<vmem>>, vector<1x256xf32>
    %cst_15 = arith.constant dense<0.000000e+00> : vector<256xf32>
    %18 = vector.multi_reduction <add>, %15, %cst_15 [0] : vector<8x256xf32> to vector<256xf32>
    %19 = vector.shape_cast %18 : vector<256xf32> to vector<1x256xf32>
    %20 = arith.mulf %15, %15 : vector<8x256xf32>
    %cst_16 = arith.constant dense<0.000000e+00> : vector<256xf32>
    %21 = vector.multi_reduction <add>, %20, %cst_16 [0] : vector<8x256xf32> to vector<256xf32>
    %22 = vector.shape_cast %21 : vector<256xf32> to vector<1x256xf32>
    %cst_17 = arith.constant 1.250000e-01 : f32
    %23 = vector.broadcast %cst_17 : f32 to vector<1x256xf32>
    %24 = arith.mulf %19, %23 : vector<1x256xf32>
    %cst_18 = arith.constant 1.250000e-01 : f32
    %25 = vector.broadcast %cst_18 : f32 to vector<1x256xf32>
    %26 = arith.mulf %22, %25 : vector<1x256xf32>
    %27 = arith.mulf %24, %24 : vector<1x256xf32>
    %28 = arith.subf %26, %27 : vector<1x256xf32>
    %cst_19 = arith.constant 8.000000e-01 : f32
    %29 = vector.broadcast %cst_19 : f32 to vector<1x256xf32>
    %30 = arith.addf %28, %29 : vector<1x256xf32>
    %31 = math.rsqrt %30 : vector<1x256xf32>
    %32 = arith.mulf %16, %31 : vector<1x256xf32>
    %33 = arith.mulf %24, %32 : vector<1x256xf32>
    %34 = arith.subf %17, %33 : vector<1x256xf32>
    %35 = vector.broadcast %32 : vector<1x256xf32> to vector<8x256xf32>
    %36 = arith.mulf %15, %35 : vector<8x256xf32>
    %37 = vector.broadcast %34 : vector<1x256xf32> to vector<8x256xf32>
    %38 = arith.addf %36, %37 : vector<8x256xf32>
    %cst_20 = arith.constant 0.000000e+00 : f32
    %39 = vector.broadcast %cst_20 : f32 to vector<8x256xf32>
    %40 = arith.cmpf ogt, %38, %39 : vector<8x256xf32>
    %cst_21 = arith.constant 2.000000e-01 : f32
    %41 = vector.broadcast %cst_21 : f32 to vector<8x256xf32>
    %42 = arith.mulf %41, %38 : vector<8x256xf32>
    %43 = arith.select %40, %38, %42 : vector<8x256xi1>, vector<8x256xf32>
    %44 = arith.truncf %43 : vector<8x256xf32> to vector<8x256xbf16>
    %c0_22 = arith.constant 0 : index
    %c0_23 = arith.constant 0 : index
    %45 = vector.load %arg7[%c0_22, %c0_23] : memref<256x512xbf16, #tpu.memory_space<vmem>>, vector<256x512xbf16>
    %cst_24 = arith.constant dense<0.000000e+00> : vector<8x512xf32>
    %46 = tpu.matmul %44, %45, %cst_24 {dimension_numbers = #tpu.dot_dimension_numbers<[1], [0], [0], [1], [0, 0, 1, 1], [], []>} : vector<8x256xbf16>, vector<256x512xbf16>, vector<8x512xf32> -> vector<8x512xf32>
    %c0_25 = arith.constant 0 : index
    %c0_26 = arith.constant 0 : index
    %47 = vector.load %arg8[%c0_25, %c0_26] : memref<1x512xf32, #tpu.memory_space<vmem>>, vector<1x512xf32>
    %c0_27 = arith.constant 0 : index
    %c0_28 = arith.constant 0 : index
    %48 = vector.load %arg9[%c0_27, %c0_28] : memref<1x512xf32, #tpu.memory_space<vmem>>, vector<1x512xf32>
    %cst_29 = arith.constant dense<0.000000e+00> : vector<512xf32>
    %49 = vector.multi_reduction <add>, %46, %cst_29 [0] : vector<8x512xf32> to vector<512xf32>
    %50 = vector.shape_cast %49 : vector<512xf32> to vector<1x512xf32>
    %51 = arith.mulf %46, %46 : vector<8x512xf32>
    %cst_30 = arith.constant dense<0.000000e+00> : vector<512xf32>
    %52 = vector.multi_reduction <add>, %51, %cst_30 [0] : vector<8x512xf32> to vector<512xf32>
    %53 = vector.shape_cast %52 : vector<512xf32> to vector<1x512xf32>
    %cst_31 = arith.constant 1.250000e-01 : f32
    %54 = vector.broadcast %cst_31 : f32 to vector<1x512xf32>
    %55 = arith.mulf %50, %54 : vector<1x512xf32>
    %cst_32 = arith.constant 1.250000e-01 : f32
    %56 = vector.broadcast %cst_32 : f32 to vector<1x512xf32>
    %57 = arith.mulf %53, %56 : vector<1x512xf32>
    %58 = arith.mulf %55, %55 : vector<1x512xf32>
    %59 = arith.subf %57, %58 : vector<1x512xf32>
    %cst_33 = arith.constant 8.000000e-01 : f32
    %60 = vector.broadcast %cst_33 : f32 to vector<1x512xf32>
    %61 = arith.addf %59, %60 : vector<1x512xf32>
    %62 = math.rsqrt %61 : vector<1x512xf32>
    %63 = arith.mulf %47, %62 : vector<1x512xf32>
    %64 = arith.mulf %55, %63 : vector<1x512xf32>
    %65 = arith.subf %48, %64 : vector<1x512xf32>
    %66 = vector.broadcast %63 : vector<1x512xf32> to vector<8x512xf32>
    %67 = arith.mulf %46, %66 : vector<8x512xf32>
    %68 = vector.broadcast %65 : vector<1x512xf32> to vector<8x512xf32>
    %69 = arith.addf %67, %68 : vector<8x512xf32>
    %cst_34 = arith.constant 0.000000e+00 : f32
    %70 = vector.broadcast %cst_34 : f32 to vector<8x512xf32>
    %71 = arith.cmpf ogt, %69, %70 : vector<8x512xf32>
    %cst_35 = arith.constant 2.000000e-01 : f32
    %72 = vector.broadcast %cst_35 : f32 to vector<8x512xf32>
    %73 = arith.mulf %72, %69 : vector<8x512xf32>
    %74 = arith.select %71, %69, %73 : vector<8x512xi1>, vector<8x512xf32>
    %75 = arith.truncf %74 : vector<8x512xf32> to vector<8x512xbf16>
    %c0_36 = arith.constant 0 : index
    %c0_37 = arith.constant 0 : index
    %76 = vector.load %arg10[%c0_36, %c0_37] : memref<512x256xbf16, #tpu.memory_space<vmem>>, vector<512x256xbf16>
    %cst_38 = arith.constant dense<0.000000e+00> : vector<8x256xf32>
    %77 = tpu.matmul %75, %76, %cst_38 {dimension_numbers = #tpu.dot_dimension_numbers<[1], [0], [0], [1], [0, 0, 1, 1], [], []>} : vector<8x512xbf16>, vector<512x256xbf16>, vector<8x256xf32> -> vector<8x256xf32>
    %c0_39 = arith.constant 0 : index
    %c0_40 = arith.constant 0 : index
    %78 = vector.load %arg11[%c0_39, %c0_40] : memref<1x256xf32, #tpu.memory_space<vmem>>, vector<1x256xf32>
    %79 = vector.broadcast %78 : vector<1x256xf32> to vector<8x256xf32>
    %80 = arith.addf %77, %79 : vector<8x256xf32>
    %81 = math.tanh %80 : vector<8x256xf32>
    %c0_41 = arith.constant 0 : index
    %c0_42 = arith.constant 0 : index
    %82 = vector.load %arg12[%c0_41, %c0_42] : memref<8x256xf32, #tpu.memory_space<vmem>>, vector<8x256xf32>
    tpu.vector_store %arg12[%c0_41, %c0_42], %81 {strides = array<i32>} : memref<8x256xf32, #tpu.memory_space<vmem>>, vector<8x256xf32>,
    return
  }
}

</mosaic_0001>

<bundles_post_ra>
// kernel: generator_forward.1
= control target key start
LH: loop header
LB: loop body
LE: loop exit
PB: predicated region body
PF: predicated region fallthrough
CT: control target
= control target key end

     0   :  { %v1904_v0 = vmov 0   ;;  %v1905_v2 = vmov 0.0   ;;  %vm1906_vm0 = vmmov 0   ;;  %vm207_vm1 = vcmask 1043456   ;;  %s2490_s0 = inlined_call_operand.vmem [shape: s32[8,1], index: 0, kind: input, shape index: {}]   ;;  %s2491_s1 = inlined_call_operand.vmem [shape: f32[8,8], index: 1, kind: input, shape index: {}]   ;;  %s2492_s4 = inlined_call_operand.vmem [shape: bf16[32,256], index: 4, kind: input, shape index: {}]   ;;  %s2493_s3 = inlined_call_operand.vmem [shape: bf16[8,256], index: 3, kind: input, shape index: {}]   ;;  %s2494_s2 = inlined_call_operand.vmem [shape: f32[8,32], index: 2, kind: input, shape index: {}]   ;;  %s2495_s7 = inlined_call_operand.vmem [shape: bf16[256,512], index: 7, kind: input, shape index: {}]   ;;  %s2496_s5 = inlined_call_operand.vmem [shape: f32[1,256], index: 5, kind: input, shape index: {}]   ;;  %s2497_s6 = inlined_call_operand.vmem [shape: f32[1,256], index: 6, kind: input, shape index: {}]   ;;  %s2498_s10 = inlined_call_operand.vmem [shape: bf16[512,256], index: 10, kind: input, shape index: {}]   ;;  %s2499_s8 = inlined_call_operand.vmem [shape: f32[1,512], index: 8, kind: input, shape index: {}]   ;;  %s2500_s9 = inlined_call_operand.vmem [shape: f32[1,512], index: 9, kind: input, shape index: {}]   ;;  %s2501_s11 = inlined_call_operand.vmem [shape: f32[1,256], index: 11, kind: input, shape index: {}]   ;;  %s2502_s12 = inlined_call_operand.vmem [shape: f32[8,256], index: 12, kind: output, shape index: {}]  }
   0x1   :  { %1687 = vset.pattern.permute.xlu0 %v1904_v0  ;;  %v42_v1 = vld [vmem:[%s2490_s0] sm:$0xff]  ;;  %1670 = vmatprep.subr.mxu0 %v1905_v2  ;;  %v1691_v6 = vld [vmem:[%s2492_s4 + $0x14] ss:$8 sps:$4 sm:$0xff]   ;;  %v1693_v8 = vld [vmem:[%s2492_s4 + $0x10] ss:$8 sps:$4 sm:$0xff]   ;;  %v43_v12 = vlaneseq  ;;  %vm52_vm2 = vcmask 64512  }
   0x2   :  { %46 = vperm.xlu0 %1687, %v42_v1   ;;  %v51_v3 = vld [vmem:[%s2491_s1] sm:$0xff]  ;;  %190 = vmatprep.mubr.bf16.mxu1 %v1904_v0  ;;  %vm154_vm4 = vcmask 261120   ;;  %v1746_v57 = vld [vmem:[%s2495_s7 + $0xc] ss:$16 sps:$4 sm:$0xff]  }
   0x3   :  { %1671 = vmatpush3.msra.mxu0 %v51_v3  ;;  %1672 = vmatprep.mubr.msk.f32.mxu0 %vm1906_vm0, %v1905_v2  ;;  %v1688_v4 = vld [vmem:[%s2492_s4 + $0x4] ss:$8 sps:$4 sm:$0xff]   ;;  %v1690_v5 = vld [vmem:[%s2492_s4] ss:$8 sps:$4 sm:$0xff]   ;;  %v44_v13 = vand.u32 127, %v43_v12 }
   0x4   :  { %158 = vmatprep.subr.bf16.mxu1 %v1688_v4  ;;  %v127_v7 = vld [vmem:[%s2493_s3] sm:$0xff] }
   0x5   :  { %159 = vmatpush1.bf16.msra.mxu1 %v1690_v5  ;;  %v1537_v9 = vcombine.high %v127_v7, %v127_v7  ;;  %v1536_v10 = vcombine.low %v127_v7, %v127_v7  ;;  %v128_v16 = vld [vmem:[%s2494_s2] sm:$0xff] }
   0x6   :  { %160 = vmatprep.subr.bf16.mxu1 %v1691_v6  ;;  %v129_v17 = vpack.c.bf16 %v128_v16, %v128_v16  ;;  %v1698_v23 = vld [vmem:[%s2495_s7 + $0x4] ss:$16 sps:$4 sm:$0xff]   ;;  %v1696_v25 = vld [vmem:[%s2495_s7] ss:$16 sps:$4 sm:$0xff]  }
   0x7   :  { %1538 = vmatprep.subr.msk.bf16.mxu0 %vm207_vm1, %v1537_v9  ;;  %v209_v11 = vsel %vm207_vm1, %v1536_v10, 0  ;;  %v1701_v27 = vld [vmem:[%s2495_s7 + $0x24] ss:$16 sps:$4 sm:$0xff]   ;;  %v1699_v28 = vld [vmem:[%s2495_s7 + $0x20] ss:$16 sps:$4 sm:$0xff]  }
   0x8   :  { %v1704_v29 = vld [vmem:[%s2495_s7 + $0x44] ss:$16 sps:$4 sm:$0xff]   ;;  %v1702_v30 = vld [vmem:[%s2495_s7 + $0x40] ss:$16 sps:$4 sm:$0xff]  }
   0x9   :  { %161 = vmatpush1.bf16.msra.mxu1 %v1693_v8  ;;  %v1707_v31 = vld [vmem:[%s2495_s7 + $0x64] ss:$16 sps:$4 sm:$0xff]   ;;  %v1705_v32 = vld [vmem:[%s2495_s7 + $0x60] ss:$16 sps:$4 sm:$0xff]  }
   0xa   :  { %753 = vmatprep.subr.bf16.mxu1 %v1698_v23  ;;  %v1710_v33 = vld [vmem:[%s2495_s7 + $0x84] ss:$16 sps:$4 sm:$0xff]   ;;  %v1708_v34 = vld [vmem:[%s2495_s7 + $0x80] ss:$16 sps:$4 sm:$0xff]  }
   0xb   :  { %v1713_v35 = vld [vmem:[%s2495_s7 + $0xa4] ss:$16 sps:$4 sm:$0xff]   ;;  %v1711_v36 = vld [vmem:[%s2495_s7 + $0xa0] ss:$16 sps:$4 sm:$0xff]  }
   0xc   :  { %1535 = vmatmul.mubr.msk.bf16.vlgmr.msra.gmra.mrb[0].mxu1 %vm154_vm4, %v129_v17  ;;  %v1716_v37 = vld [vmem:[%s2495_s7 + $0xc4] ss:$16 sps:$4 sm:$0xff]   ;;  %v1714_v38 = vld [vmem:[%s2495_s7 + $0xc0] ss:$16 sps:$4 sm:$0xff]  }
   0xd   :  { %754 = vmatpush1.bf16.msra.mxu1 %v1696_v25  ;;  %v1719_v39 = vld [vmem:[%s2495_s7 + $0xe4] ss:$16 sps:$4 sm:$0xff]   ;;  %v1717_v40 = vld [vmem:[%s2495_s7 + $0xe0] ss:$16 sps:$4 sm:$0xff]  }
   0xe   :  { %755 = vmatprep.subr.bf16.mxu1 %v1701_v27  ;;  %v1722_v41 = vld [vmem:[%s2495_s7 + $0x104] ss:$16 sps:$4 sm:$0xff]   ;;  %v1720_v42 = vld [vmem:[%s2495_s7 + $0x100] ss:$16 sps:$4 sm:$0xff]  }
   0xf   :  { %v1725_v43 = vld [vmem:[%s2495_s7 + $0x124] ss:$16 sps:$4 sm:$0xff]   ;;  %v1723_v44 = vld [vmem:[%s2495_s7 + $0x120] ss:$16 sps:$4 sm:$0xff]  }
  0x10   :  { %v1728_v45 = vld [vmem:[%s2495_s7 + $0x144] ss:$16 sps:$4 sm:$0xff]   ;;  %v1726_v46 = vld [vmem:[%s2495_s7 + $0x140] ss:$16 sps:$4 sm:$0xff]  }
  0x11   :  { %756 = vmatpush1.bf16.msra.mxu1 %v1699_v28  ;;  %v1731_v47 = vld [vmem:[%s2495_s7 + $0x164] ss:$16 sps:$4 sm:$0xff]   ;;  %v1729_v48 = vld [vmem:[%s2495_s7 + $0x160] ss:$16 sps:$4 sm:$0xff]  }
  0x12   :  { %757 = vmatprep.subr.bf16.mxu1 %v1704_v29  ;;  %v1734_v49 = vld [vmem:[%s2495_s7 + $0x184] ss:$16 sps:$4 sm:$0xff]   ;;  %v1732_v50 = vld [vmem:[%s2495_s7 + $0x180] ss:$16 sps:$4 sm:$0xff]  }
  0x13   :  { %v1735_v51 = vld [vmem:[%s2495_s7 + $0x1a0] ss:$16 sps:$4 sm:$0xff]   ;;  %v1737_v52 = vld [vmem:[%s2495_s7 + $0x1a4] ss:$16 sps:$4 sm:$0xff]  }
  0x14   :  { %v1740_v53 = vld [vmem:[%s2495_s7 + $0x1c4] ss:$16 sps:$4 sm:$0xff]   ;;  %v1738_v54 = vld [vmem:[%s2495_s7 + $0x1c0] ss:$16 sps:$4 sm:$0xff]  }
  0x15   :  { %758 = vmatpush1.bf16.msra.mxu1 %v1702_v30  ;;  %v1743_v55 = vld [vmem:[%s2495_s7 + $0x1e4] ss:$16 sps:$4 sm:$0xff]   ;;  %v1741_v56 = vld [vmem:[%s2495_s7 + $0x1e0] ss:$16 sps:$4 sm:$0xff]  }
  0x16   :  { %759 = vmatprep.subr.bf16.mxu1 %v1707_v31 }
  0x19   :  { %760 = vmatpush1.bf16.msra.mxu1 %v1705_v32 }
  0x1a   :  { %761 = vmatprep.subr.bf16.mxu1 %v1710_v33 }
  0x1d   :  { %762 = vmatpush1.bf16.msra.mxu1 %v1708_v34 }
  0x1e   :  { %763 = vmatprep.subr.bf16.mxu1 %v1713_v35 }
  0x21   :  { %764 = vmatpush1.bf16.msra.mxu1 %v1711_v36 }
  0x22   :  { %765 = vmatprep.subr.bf16.mxu1 %v1716_v37  ;;  %v1907_v37 = vmov 1966171168  }
  0x25   :  { %766 = vmatpush1.bf16.msra.mxu1 %v1714_v38  ;;  %v299_v38 = vunpack.c.l.s4 %v1907_v37  ;;  %v1791_v37 = vld [vmem:[%s2495_s7 + $0x1ec] ss:$16 sps:$4 sm:$0xff]  }
  0x26   :  { %767 = vmatprep.subr.bf16.mxu1 %v1719_v39 }
  0x27   :  { %v300_v39 = vunpack.c.0.s8 %v299_v38  ;;  %v1789_v38 = vld [vmem:[%s2495_s7 + $0x1e8] ss:$16 sps:$4 sm:$0xff]  }
  0x29   :  { %768 = vmatpush1.bf16.msra.mxu1 %v1717_v40  ;;  %v2110_v40 = vshrl.u32 %v43_v12, 7 }
  0x2a   :  { %769 = vmatprep.subr.bf16.mxu1 %v1722_v41 }
  0x2d   :  { %770 = vmatpush1.bf16.msra.mxu1 %v1720_v42  ;;  %v2113_v42 = vsub.s32 %v300_v39, %v2110_v40  ;;  %v1794_v39 = vld [vmem:[%s2498_s10 + $0x4] ss:$8 sps:$4 sm:$0xff]  }
  0x2e   :  { %771 = vmatprep.subr.bf16.mxu1 %v1725_v43 }
  0x31   :  { %772 = vmatpush1.bf16.msra.mxu1 %v1723_v44 }
  0x32   :  { %773 = vmatprep.subr.bf16.mxu1 %v1728_v45 }
  0x35   :  { %774 = vmatpush1.bf16.msra.mxu1 %v1726_v46  ;;  %v255_v46 = vld [vmem:[%s2496_s5] sm:$0x3] }
  0x36   :  { %775 = vmatprep.subr.bf16.mxu1 %v1731_v47  ;;  %v2120_v47 = vsub.s32 0, %v2110_v40 }
  0x39   :  { %776 = vmatpush1.bf16.msra.mxu1 %v1729_v48  ;;  %v2123_v48 = vsub.s32 1, %v2110_v40 }
  0x3a   :  { %777 = vmatprep.subr.bf16.mxu1 %v1734_v49 }
  0x3d   :  { %778 = vmatpush1.bf16.msra.mxu1 %v1732_v50 }
  0x3e   :  { %779 = vmatprep.subr.bf16.mxu1 %v1737_v52 }
  0x41   :  { %780 = vmatpush1.bf16.msra.mxu1 %v1735_v51 }
  0x42   :  { %781 = vmatprep.subr.bf16.mxu1 %v1740_v53 }
  0x45   :  { %782 = vmatpush1.bf16.msra.mxu1 %v1738_v54 }
  0x46   :  { %783 = vmatprep.subr.bf16.mxu1 %v1743_v55 }
  0x49   :  { %784 = vmatpush1.bf16.msra.mxu1 %v1741_v56 }
  0x4a   :  { %794 = vmatprep.subr.bf16.mxu1 %v1746_v57 }
  0x81   :  { %v47_v14 = vpop.permute.xlu0 %46 }
  0x82   :  { %vm48_vm3 = vcmp.eq.s32.totalorder %v47_v14, %v44_v13 }
  0x83   :  { %v1529_v15 = vsel %vm48_vm3, 1.0, %v1905_v2 }
  0x84   :  { %1673 = vmatmul.mubr.msk.f32.vlgmr.msra.gmra.mrb[0].mxu0 %vm52_vm2, %v1529_v15 }
  0x85   :  { %215 = vmatpush1.bf16.msra.mxu0 %v209_v11  ;;  %246 = vmatprep.mubr.bf16.mxu0 %v1904_v0 }
  0x86   :  { %1439 = vmatprep.subr.bf16.mxu0 %v1794_v39 }
  0xdf   :  { %v1998_v21 = vpop.f32.mrb[0].mxu1 }
  0xe0   :  { %v2000_v22 = vpop.f32.mrb[1].mxu1 }
  0xe1   :  { %v196_v24 = vpop.f32.mrb[2].mxu1 }
  0xe2   :  { %v197_v26 = vpop.f32.mrb[3].mxu1 }
 0x157   :  { %v122_v18 = vpop.f32.mrb[0].mxu0 }
 0x158   :  { %v126_v19 = vpack.c.bf16 %v122_v18, %v122_v18  ;;  %v1674_v20 = vpop.f32.mrb[1].mxu0 }
 0x15a   :  { %1539 = vmatmul.mubr.msk.bf16.vlgmr.msra.gmra.mrb[4].mxu0 %vm52_vm2, %v126_v19 }
 0x22d   :  { %v248_v58 = vpop.f32.mrb[4].mxu0 }
 0x22e   :  { %v2102_v59 = vadd.f32 %v248_v58, %v1998_v21  ;;  %v250_v60 = vpop.f32.mrb[5].mxu0  ;;  %v256_v58 = vld [vmem:[%s2497_s6] sm:$0x3] }
 0x22f   :  { %v251_v61 = vadd.f32 %v250_v60, %v2000_v22  ;;  %v252_v62 = vpop.f32.mrb[6].mxu0 }
 0x230   :  { %v257_v63 = vrot.slane %v2102_v59, 4  ;;  %v269_v0 = vmul.f32 %v2102_v59, %v2102_v59  ;;  %v253_v1 = vpop.f32.mrb[7].mxu0 }
 0x231   :  { %v263_v2 = vrot.slane %v251_v61, 4  ;;  %v270_v3 = vmul.f32 %v251_v61, %v251_v61 }
 0x232   :  { %v258_v4 = vadd.f32 %v257_v63, %v2102_v59  ;;  %v271_v5 = vrot.slane %v269_v0, 4 }
 0x233   :  { %v264_v6 = vadd.f32 %v263_v2, %v251_v61  ;;  %v277_v7 = vrot.slane %v270_v3, 4 }
 0x234   :  { %v259_v8 = vrot.slane %v258_v4, 2  ;;  %v272_v9 = vadd.f32 %v271_v5, %v269_v0 }
 0x235   :  { %v265_v10 = vrot.slane %v264_v6, 2  ;;  %v278_v11 = vadd.f32 %v277_v7, %v270_v3 }
 0x236   :  { %v260_v13 = vadd.f32 %v259_v8, %v258_v4  ;;  %v273_v14 = vrot.slane %v272_v9, 2  ;;  %v1749_v8 = vld [vmem:[%s2495_s7 + $0x2c] ss:$16 sps:$4 sm:$0xff]  }
 0x237   :  { %v266_v15 = vadd.f32 %v265_v10, %v264_v6  ;;  %v279_v16 = vrot.slane %v278_v11, 2  ;;  %v1744_v6 = vld [vmem:[%s2495_s7 + $0x8] ss:$16 sps:$4 sm:$0xff]   ;;  %v1752_v10 = vld [vmem:[%s2495_s7 + $0x4c] ss:$16 sps:$4 sm:$0xff]  }
 0x238   :  { %v261_v17 = vrot.slane %v260_v13, 1  ;;  %v274_v18 = vadd.f32 %v273_v14, %v272_v9  ;;  %v1747_v9 = vld [vmem:[%s2495_s7 + $0x28] ss:$16 sps:$4 sm:$0xff]  }
 0x239   :  { %v267_v19 = vrot.slane %v266_v15, 1  ;;  %v280_v20 = vadd.f32 %v279_v16, %v278_v11  ;;  %v1750_v11 = vld [vmem:[%s2495_s7 + $0x48] ss:$16 sps:$4 sm:$0xff]  }
 0x23a   :  { %v262_v21 = vadd.f32 %v261_v17, %v260_v13  ;;  %v275_v22 = vrot.slane %v274_v18, 1  ;;  %v1755_v13 = vld [vmem:[%s2495_s7 + $0x6c] ss:$16 sps:$4 sm:$0xff]   ;;  %v1753_v14 = vld [vmem:[%s2495_s7 + $0x68] ss:$16 sps:$4 sm:$0xff]  }
 0x23b   :  { %v268_v23 = vadd.f32 %v267_v19, %v266_v15  ;;  %v281_v24 = vrot.slane %v280_v20, 1  ;;  %v1758_v15 = vld [vmem:[%s2495_s7 + $0x8c] ss:$16 sps:$4 sm:$0xff]   ;;  %v1756_v16 = vld [vmem:[%s2495_s7 + $0x88] ss:$16 sps:$4 sm:$0xff]  }
 0x23c   :  { %v276_v25 = vadd.f32 %v275_v22, %v274_v18  ;;  %v283_v26 = vmul.f32 0.125, %v262_v21  ;;  %v1761_v17 = vld [vmem:[%s2495_s7 + $0xac] ss:$16 sps:$4 sm:$0xff]   ;;  %v1759_v18 = vld [vmem:[%s2495_s7 + $0xa8] ss:$16 sps:$4 sm:$0xff]  }
 0x23d   :  { %v282_v27 = vadd.f32 %v281_v24, %v280_v20  ;;  %v284_v28 = vmul.f32 0.125, %v268_v23  ;;  %v1764_v19 = vld [vmem:[%s2495_s7 + $0xcc] ss:$16 sps:$4 sm:$0xff]   ;;  %v1762_v20 = vld [vmem:[%s2495_s7 + $0xc8] ss:$16 sps:$4 sm:$0xff]  }
 0x23e   :  { %v285_v29 = vmul.f32 0.125, %v276_v25  ;;  %v287_v30 = vmul.f32 %v283_v26, %v283_v26  ;;  %v1767_v21 = vld [vmem:[%s2495_s7 + $0xec] ss:$16 sps:$4 sm:$0xff]   ;;  %v1765_v22 = vld [vmem:[%s2495_s7 + $0xe8] ss:$16 sps:$4 sm:$0xff]  }
 0x23f   :  { %v286_v31 = vmul.f32 0.125, %v282_v27  ;;  %v288_v32 = vmul.f32 %v284_v28, %v284_v28  ;;  %v1770_v23 = vld [vmem:[%s2495_s7 + $0x10c] ss:$16 sps:$4 sm:$0xff]   ;;  %v1768_v24 = vld [vmem:[%s2495_s7 + $0x108] ss:$16 sps:$4 sm:$0xff]  }
 0x240   :  { %v289_v33 = vsub.f32 %v285_v29, %v287_v30  ;;  %v1773_v25 = vld [vmem:[%s2495_s7 + $0x12c] ss:$16 sps:$4 sm:$0xff]   ;;  %v1777_v30 = vld [vmem:[%s2495_s7 + $0x168] ss:$16 sps:$4 sm:$0xff]  }
 0x241   :  { %v290_v34 = vsub.f32 %v286_v31, %v288_v32  ;;  %v1776_v27 = vld [vmem:[%s2495_s7 + $0x14c] ss:$16 sps:$4 sm:$0xff]   ;;  %v1780_v32 = vld [vmem:[%s2495_s7 + $0x188] ss:$16 sps:$4 sm:$0xff]  }
 0x242   :  { %v291_v35 = vadd.f32 0.8, %v289_v33  ;;  %v1779_v29 = vld [vmem:[%s2495_s7 + $0x16c] ss:$16 sps:$4 sm:$0xff]  }
 0x243   :  { %v292_v36 = vadd.f32 0.8, %v290_v34  ;;  %v1782_v31 = vld [vmem:[%s2495_s7 + $0x18c] ss:$16 sps:$4 sm:$0xff]   ;;  %v1783_v34 = vld [vmem:[%s2495_s7 + $0x1a8] ss:$16 sps:$4 sm:$0xff]  }
 0x244   :  { %1888 = vrsqrt.f32 %v291_v35  ;;  %v1785_v33 = vld [vmem:[%s2495_s7 + $0x1ac] ss:$16 sps:$4 sm:$0xff]  }
 0x245   :  { %1890 = vrsqrt.f32 %v292_v36  ;;  %v1788_v35 = vld [vmem:[%s2495_s7 + $0x1cc] ss:$16 sps:$4 sm:$0xff]   ;;  %v1786_v36 = vld [vmem:[%s2495_s7 + $0x1c8] ss:$16 sps:$4 sm:$0xff]  }
 0x24e   :  { %v1889_v41 = vpop.eup %1888 }
 0x24f   :  { %v1891_v43 = vpop.eup %1890 }
 0x250   :  { %v297_v44 = vcombine.low %v1889_v41, %v1891_v43  ;;  %v1792_v41 = vld [vmem:[%s2498_s10] ss:$8 sps:$4 sm:$0xff]   ;;  %v1797_v43 = vld [vmem:[%s2498_s10 + $0x14] ss:$8 sps:$4 sm:$0xff]  }
 0x251   :  { %1440 = vmatpush1.bf16.msra.mxu0 %v1792_v41 }
 0x252   :  { %v304_v45 = vrot.slane %v297_v44, %v2113_v42  ;;  %v1795_v44 = vld [vmem:[%s2498_s10 + $0x10] ss:$8 sps:$4 sm:$0xff]   ;;  %1441 = vmatprep.subr.bf16.mxu0 %v1797_v43 }
 0x254   :  { %v311_v12 = vrot.slane %v304_v45, %v2113_v42  ;;  %v1800_v45 = vld [vmem:[%s2498_s10 + $0x24] ss:$8 sps:$4 sm:$0xff]  }
 0x255   :  { %1442 = vmatpush1.bf16.msra.mxu0 %v1795_v44 }
 0x256   :  { %v313_v49 = vmul.f32 %v311_v12, %v255_v46  ;;  %v1798_v46 = vld [vmem:[%s2498_s10 + $0x20] ss:$8 sps:$4 sm:$0xff]   ;;  %1443 = vmatprep.subr.bf16.mxu0 %v1800_v45  ;;  %v1803_v12 = vld [vmem:[%s2498_s10 + $0x34] ss:$8 sps:$4 sm:$0xff]  }
 0x258   :  { %v318_v50 = vrot.slane %v313_v49, %v2120_v47  ;;  %v322_v51 = vrot.slane %v313_v49, %v2123_v48  ;;  %v1801_v49 = vld [vmem:[%s2498_s10 + $0x30] ss:$8 sps:$4 sm:$0xff]  }
 0x259   :  { %1444 = vmatpush1.bf16.msra.mxu0 %v1798_v46 }
 0x25a   :  { %v325_v52 = vmul.f32 %v318_v50, %v283_v26  ;;  %v326_v53 = vmul.f32 %v322_v51, %v284_v28  ;;  %v347_v54 = vmul.f32 %v322_v51, %v251_v61  ;;  %v346_v55 = vmul.f32 %v318_v50, %v2102_v59  ;;  %v1771_v26 = vld [vmem:[%s2495_s7 + $0x128] ss:$16 sps:$4 sm:$0xff]   ;;  %1445 = vmatprep.subr.bf16.mxu0 %v1803_v12  ;;  %v1806_v50 = vld [vmem:[%s2498_s10 + $0x44] ss:$8 sps:$4 sm:$0xff]  }
 0x25b   :  { %v1774_v28 = vld [vmem:[%s2495_s7 + $0x148] ss:$16 sps:$4 sm:$0xff]  }
 0x25c   :  { %v329_v56 = vcombine.low %v325_v52, %v326_v53  ;;  %v1804_v51 = vld [vmem:[%s2498_s10 + $0x40] ss:$8 sps:$4 sm:$0xff]   ;;  %v1809_v52 = vld [vmem:[%s2498_s10 + $0x54] ss:$8 sps:$4 sm:$0xff]   ;;  %v1807_v53 = vld [vmem:[%s2498_s10 + $0x50] ss:$8 sps:$4 sm:$0xff]  }
 0x25d   :  { %1446 = vmatpush1.bf16.msra.mxu0 %v1801_v49 }
 0x25e   :  { %v336_v57 = vrot.slane %v329_v56, %v2113_v42  ;;  %1447 = vmatprep.subr.bf16.mxu0 %v1806_v50  ;;  %v1815_v56 = vld [vmem:[%s2498_s10 + $0x74] ss:$8 sps:$4 sm:$0xff]  }
 0x260   :  { %v343_v60 = vrot.slane %v336_v57, %v2113_v42  ;;  %v1813_v57 = vld [vmem:[%s2498_s10 + $0x70] ss:$8 sps:$4 sm:$0xff]  }
 0x261   :  { %1448 = vmatpush1.bf16.msra.mxu0 %v1804_v51 }
 0x262   :  { %v345_v62 = vsub.f32 %v256_v58, %v343_v60  ;;  %1449 = vmatprep.subr.bf16.mxu0 %v1809_v52  ;;  %v1818_v58 = vld [vmem:[%s2498_s10 + $0x84] ss:$8 sps:$4 sm:$0xff]   ;;  %v1816_v60 = vld [vmem:[%s2498_s10 + $0x80] ss:$8 sps:$4 sm:$0xff]  }
 0x264   :  { %v356_v63 = vrot.slane %v345_v62, %v2123_v48  ;;  %v352_v0 = vrot.slane %v345_v62, %v2120_v47  ;;  %v1821_v62 = vld [vmem:[%s2498_s10 + $0x94] ss:$8 sps:$4 sm:$0xff]  }
 0x265   :  { %1450 = vmatpush1.bf16.msra.mxu0 %v1807_v53 }
 0x266   :  { %v360_v1 = vadd.f32 %v356_v63, %v347_v54  ;;  %v359_v2 = vadd.f32 %v352_v0, %v346_v55  ;;  %v1812_v54 = vld [vmem:[%s2498_s10 + $0x64] ss:$8 sps:$4 sm:$0xff]   ;;  %v1810_v55 = vld [vmem:[%s2498_s10 + $0x60] ss:$8 sps:$4 sm:$0xff]   ;;  %v1819_v63 = vld [vmem:[%s2498_s10 + $0x90] ss:$8 sps:$4 sm:$0xff]  }
 0x267   :  { %1451 = vmatprep.subr.bf16.mxu0 %v1812_v54  ;;  %v1824_v0 = vld [vmem:[%s2498_s10 + $0xa4] ss:$8 sps:$4 sm:$0xff]  }
 0x268   :  { %vm362_vm5 = vcmp.gt.f32.partialorder %v360_v1, 0.0  ;;  %v364_v61 = vmul.f32 0.2, %v360_v1  ;;  %vm361_vm6 = vcmp.gt.f32.partialorder %v359_v2, 0.0  ;;  %v363_v59 = vmul.f32 0.2, %v359_v2 }
 0x269   :  { %1452 = vmatpush1.bf16.msra.mxu0 %v1810_v55 }
 0x26a   :  { %v366_v3 = vsel %vm362_vm5, %v360_v1, %v364_v61  ;;  %v365_v4 = vsel %vm361_vm6, %v359_v2, %v363_v59  ;;  %1453 = vmatprep.subr.bf16.mxu0 %v1815_v56  ;;  %v1822_v1 = vld [vmem:[%s2498_s10 + $0xa0] ss:$8 sps:$4 sm:$0xff]   ;;  %v1827_v2 = vld [vmem:[%s2498_s10 + $0xb4] ss:$8 sps:$4 sm:$0xff]   ;;  %v1825_v61 = vld [vmem:[%s2498_s10 + $0xb0] ss:$8 sps:$4 sm:$0xff]  }
 0x26b   :  { %v368_v5 = vpack.c.bf16 %v366_v3, %v366_v3  ;;  %v2139_v7 = vpack.c.bf16 %v365_v4, %v365_v4  ;;  %v1830_v59 = vld [vmem:[%s2498_s10 + $0xc4] ss:$8 sps:$4 sm:$0xff]   ;;  %v1828_v3 = vld [vmem:[%s2498_s10 + $0xc0] ss:$8 sps:$4 sm:$0xff]   ;;  %v1833_v4 = vld [vmem:[%s2498_s10 + $0xd4] ss:$8 sps:$4 sm:$0xff]  }
 0x26d   :  { %785 = vmatprep.mubr.bf16.mxu1 %v368_v5  ;;  %1454 = vmatpush1.bf16.msra.mxu0 %v1813_v57 }
 0x26e   :  { %786 = vmatmul.mubr.bf16.vlgmr.msra.gmra.mrb[4].mxu1 %v2139_v7  ;;  %1455 = vmatprep.subr.bf16.mxu0 %v1818_v58 }
 0x26f   :  { %795 = vmatpush1.bf16.msra.mxu1 %v1744_v6  ;;  %826 = vmatprep.mubr.bf16.mxu1 %v368_v5  ;;  %v1831_v5 = vld [vmem:[%s2498_s10 + $0xd0] ss:$8 sps:$4 sm:$0xff]   ;;  %v1836_v6 = vld [vmem:[%s2498_s10 + $0xe4] ss:$8 sps:$4 sm:$0xff]  }
 0x270   :  { %796 = vmatprep.subr.bf16.mxu1 %v1749_v8  ;;  %v1839_v8 = vld [vmem:[%s2498_s10 + $0xf4] ss:$8 sps:$4 sm:$0xff]  }
 0x271   :  { %1456 = vmatpush1.bf16.msra.mxu0 %v1816_v60 }
 0x272   :  { %1457 = vmatprep.subr.bf16.mxu0 %v1821_v62 }
 0x273   :  { %797 = vmatpush1.bf16.msra.mxu1 %v1747_v9  ;;  %v1837_v9 = vld [vmem:[%s2498_s10 + $0xf0] ss:$8 sps:$4 sm:$0xff]  }
 0x274   :  { %798 = vmatprep.subr.bf16.mxu1 %v1752_v10 }
 0x275   :  { %1458 = vmatpush1.bf16.msra.mxu0 %v1819_v63 }
 0x276   :  { %1459 = vmatprep.subr.bf16.mxu0 %v1824_v0 }
 0x277   :  { %799 = vmatpush1.bf16.msra.mxu1 %v1750_v11 }
 0x278   :  { %800 = vmatprep.subr.bf16.mxu1 %v1755_v13 }
 0x279   :  { %1460 = vmatpush1.bf16.msra.mxu0 %v1822_v1 }
 0x27a   :  { %1461 = vmatprep.subr.bf16.mxu0 %v1827_v2 }
 0x27b   :  { %801 = vmatpush1.bf16.msra.mxu1 %v1753_v14 }
 0x27c   :  { %802 = vmatprep.subr.bf16.mxu1 %v1758_v15  ;;  %v1842_v15 = vld [vmem:[%s2498_s10 + $0x104] ss:$8 sps:$4 sm:$0xff]  }
 0x27d   :  { %1462 = vmatpush1.bf16.msra.mxu0 %v1825_v61 }
 0x27e   :  { %1463 = vmatprep.subr.bf16.mxu0 %v1830_v59 }
 0x27f   :  { %803 = vmatpush1.bf16.msra.mxu1 %v1756_v16 }
 0x280   :  { %804 = vmatprep.subr.bf16.mxu1 %v1761_v17 }
 0x281   :  { %1464 = vmatpush1.bf16.msra.mxu0 %v1828_v3 }
 0x282   :  { %1465 = vmatprep.subr.bf16.mxu0 %v1833_v4 }
 0x283   :  { %805 = vmatpush1.bf16.msra.mxu1 %v1759_v18 }
 0x284   :  { %806 = vmatprep.subr.bf16.mxu1 %v1764_v19 }
 0x285   :  { %1466 = vmatpush1.bf16.msra.mxu0 %v1831_v5 }
 0x286   :  { %1467 = vmatprep.subr.bf16.mxu0 %v1836_v6 }
 0x287   :  { %807 = vmatpush1.bf16.msra.mxu1 %v1762_v20 }
 0x288   :  { %808 = vmatprep.subr.bf16.mxu1 %v1767_v21 }
 0x28b   :  { %809 = vmatpush1.bf16.msra.mxu1 %v1765_v22 }
 0x28c   :  { %810 = vmatprep.subr.bf16.mxu1 %v1770_v23 }
 0x28f   :  { %811 = vmatpush1.bf16.msra.mxu1 %v1768_v24 }
 0x290   :  { %812 = vmatprep.subr.bf16.mxu1 %v1773_v25 }
 0x293   :  { %813 = vmatpush1.bf16.msra.mxu1 %v1771_v26 }
 0x294   :  { %814 = vmatprep.subr.bf16.mxu1 %v1776_v27 }
 0x297   :  { %815 = vmatpush1.bf16.msra.mxu1 %v1774_v28 }
 0x298   :  { %816 = vmatprep.subr.bf16.mxu1 %v1779_v29 }
 0x29b   :  { %817 = vmatpush1.bf16.msra.mxu1 %v1777_v30 }
 0x29c   :  { %818 = vmatprep.subr.bf16.mxu1 %v1782_v31 }
 0x29f   :  { %819 = vmatpush1.bf16.msra.mxu1 %v1780_v32 }
 0x2a0   :  { %820 = vmatprep.subr.bf16.mxu1 %v1785_v33 }
 0x2a3   :  { %821 = vmatpush1.bf16.msra.mxu1 %v1783_v34 }
 0x2a4   :  { %822 = vmatprep.subr.bf16.mxu1 %v1788_v35 }
 0x2a7   :  { %823 = vmatpush1.bf16.msra.mxu1 %v1786_v36 }
 0x2a8   :  { %824 = vmatprep.subr.bf16.mxu1 %v1791_v37 }
 0x2ab   :  { %825 = vmatpush1.bf16.msra.mxu1 %v1789_v38 }
 0x2ae   :  { %827 = vmatmul.mubr.bf16.vlgmr.msra.gmra.mrb[8].mxu1 %v2139_v7  ;;  %v1834_v7 = vld [vmem:[%s2498_s10 + $0xe0] ss:$8 sps:$4 sm:$0xff]  }
 0x2af   :  { %1468 = vmatpush1.bf16.msra.mxu0 %v1834_v7 }
 0x2b0   :  { %1469 = vmatprep.subr.bf16.mxu0 %v1839_v8 }
 0x2b3   :  { %1470 = vmatpush1.bf16.msra.mxu0 %v1837_v9 }
 0x2b4   :  { %1480 = vmatprep.subr.bf16.mxu0 %v1842_v15 }
 0x341   :  { %v2329_v10 = vpop.f32.mrb[4].mxu1 }
 0x342   :  { %v837_v11 = vrot.slane %v2329_v10, 4  ;;  %v861_v13 = vmul.f32 %v2329_v10, %v2329_v10  ;;  %v2334_v14 = vpop.f32.mrb[5].mxu1 }
 0x343   :  { %v843_v16 = vrot.slane %v2334_v14, 4  ;;  %v862_v17 = vmul.f32 %v2334_v14, %v2334_v14  ;;  %v791_v18 = vpop.f32.mrb[6].mxu1 }
 0x344   :  { %v838_v19 = vadd.f32 %v837_v11, %v2329_v10  ;;  %v865_v20 = vrot.slane %v861_v13, 4  ;;  %v792_v21 = vpop.f32.mrb[7].mxu1 }
 0x345   :  { %v844_v22 = vadd.f32 %v843_v16, %v2334_v14  ;;  %v871_v23 = vrot.slane %v862_v17, 4 }
 0x346   :  { %v839_v24 = vrot.slane %v838_v19, 2  ;;  %v866_v25 = vadd.f32 %v865_v20, %v861_v13 }
 0x347   :  { %v845_v26 = vrot.slane %v844_v22, 2  ;;  %v872_v27 = vadd.f32 %v871_v23, %v862_v17 }
 0x348   :  { %v840_v28 = vadd.f32 %v839_v24, %v838_v19  ;;  %v867_v29 = vrot.slane %v866_v25, 2 }
 0x349   :  { %v846_v30 = vadd.f32 %v845_v26, %v844_v22  ;;  %v873_v31 = vrot.slane %v872_v27, 2 }
 0x34a   :  { %v841_v32 = vrot.slane %v840_v28, 1  ;;  %v868_v33 = vadd.f32 %v867_v29, %v866_v25 }
 0x34b   :  { %v847_v34 = vrot.slane %v846_v30, 1  ;;  %v874_v35 = vadd.f32 %v873_v31, %v872_v27 }
 0x34c   :  { %v842_v36 = vadd.f32 %v841_v32, %v840_v28  ;;  %v869_v37 = vrot.slane %v868_v33, 1 }
 0x34d   :  { %v848_v38 = vadd.f32 %v847_v34, %v846_v30  ;;  %v875_v39 = vrot.slane %v874_v35, 1 }
 0x34e   :  { %v870_v41 = vadd.f32 %v869_v37, %v868_v33  ;;  %v2344_v43 = vmul.f32 0.125, %v842_v36 }
 0x34f   :  { %v876_v44 = vadd.f32 %v875_v39, %v874_v35  ;;  %v2346_v45 = vmul.f32 0.125, %v848_v38 }
 0x350   :  { %v893_v46 = vmul.f32 0.125, %v870_v41  ;;  %v897_v12 = vmul.f32 %v2344_v43, %v2344_v43 }
 0x351   :  { %v894_v49 = vmul.f32 0.125, %v876_v44  ;;  %v898_v50 = vmul.f32 %v2346_v45, %v2346_v45 }
 0x352   :  { %v901_v51 = vsub.f32 %v893_v46, %v897_v12  ;;  %v835_v12 = vld [vmem:[%s2499_s8] sm:$0xf] }
 0x353   :  { %v902_v52 = vsub.f32 %v894_v49, %v898_v50  ;;  %v954_v50 = vsub.s32 2, %v2110_v40 }
 0x354   :  { %v905_v53 = vadd.f32 0.8, %v901_v51  ;;  %v958_v51 = vsub.s32 3, %v2110_v40 }
 0x355   :  { %v906_v54 = vadd.f32 0.8, %v902_v52 }
 0x356   :  { %1892 = vrsqrt.f32 %v905_v53 }
 0x357   :  { %1894 = vrsqrt.f32 %v906_v54 }
 0x360   :  { %v1893_v55 = vpop.eup %1892 }
 0x361   :  { %v1895_v56 = vpop.eup %1894 }
 0x362   :  { %v917_v57 = vcombine.low %v1893_v55, %v1895_v56 }
 0x364   :  { %v925_v41 = vrot.slane %v917_v57, %v2113_v42 }
 0x381   :  { %v2352_v58 = vpop.f32.mrb[8].mxu1 }
 0x382   :  { %v849_v60 = vrot.slane %v2352_v58, 4  ;;  %v863_v62 = vmul.f32 %v2352_v58, %v2352_v58  ;;  %v830_v63 = vpop.f32.mrb[9].mxu1 }
 0x383   :  { %v855_v0 = vrot.slane %v830_v63, 4  ;;  %v864_v1 = vmul.f32 %v830_v63, %v830_v63  ;;  %v832_v2 = vpop.f32.mrb[10].mxu1 }
 0x384   :  { %v850_v61 = vadd.f32 %v849_v60, %v2352_v58  ;;  %v877_v59 = vrot.slane %v863_v62, 4  ;;  %v833_v3 = vpop.f32.mrb[11].mxu1 }
 0x385   :  { %v856_v4 = vadd.f32 %v855_v0, %v830_v63  ;;  %v883_v5 = vrot.slane %v864_v1, 4 }
 0x386   :  { %v851_v6 = vrot.slane %v850_v61, 2  ;;  %v878_v7 = vadd.f32 %v877_v59, %v863_v62 }
 0x387   :  { %v857_v8 = vrot.slane %v856_v4, 2  ;;  %v884_v9 = vadd.f32 %v883_v5, %v864_v1 }
 0x388   :  { %v852_v11 = vadd.f32 %v851_v6, %v850_v61  ;;  %v879_v13 = vrot.slane %v878_v7, 2 }
 0x389   :  { %v858_v15 = vadd.f32 %v857_v8, %v856_v4  ;;  %v885_v16 = vrot.slane %v884_v9, 2 }
 0x38a   :  { %v853_v17 = vrot.slane %v852_v11, 1  ;;  %v880_v18 = vadd.f32 %v879_v13, %v878_v7 }
 0x38b   :  { %v859_v19 = vrot.slane %v858_v15, 1  ;;  %v886_v20 = vadd.f32 %v885_v16, %v884_v9 }
 0x38c   :  { %v854_v21 = vadd.f32 %v853_v17, %v852_v11  ;;  %v881_v22 = vrot.slane %v880_v18, 1 }
 0x38d   :  { %v860_v23 = vadd.f32 %v859_v19, %v858_v15  ;;  %v887_v24 = vrot.slane %v886_v20, 1 }
 0x38e   :  { %v882_v25 = vadd.f32 %v881_v22, %v880_v18  ;;  %v891_v26 = vmul.f32 0.125, %v854_v21 }
 0x38f   :  { %v888_v27 = vadd.f32 %v887_v24, %v886_v20  ;;  %v892_v28 = vmul.f32 0.125, %v860_v23  ;;  %v1840_v20 = vld [vmem:[%s2498_s10 + $0x100] ss:$8 sps:$4 sm:$0xff]   ;;  %v1845_v23 = vld [vmem:[%s2498_s10 + $0x114] ss:$8 sps:$4 sm:$0xff]  }
 0x390   :  { %v895_v29 = vmul.f32 0.125, %v882_v25  ;;  %v899_v30 = vmul.f32 %v891_v26, %v891_v26  ;;  %v1843_v25 = vld [vmem:[%s2498_s10 + $0x110] ss:$8 sps:$4 sm:$0xff]  }
 0x391   :  { %v896_v31 = vmul.f32 0.125, %v888_v27  ;;  %v900_v32 = vmul.f32 %v892_v28, %v892_v28  ;;  %v1846_v27 = vld [vmem:[%s2498_s10 + $0x120] ss:$8 sps:$4 sm:$0xff]  }
 0x392   :  { %v903_v33 = vsub.f32 %v895_v29, %v899_v30  ;;  %v1849_v29 = vld [vmem:[%s2498_s10 + $0x130] ss:$8 sps:$4 sm:$0xff]   ;;  %v1854_v30 = vld [vmem:[%s2498_s10 + $0x144] ss:$8 sps:$4 sm:$0xff]  }
 0x393   :  { %v904_v34 = vsub.f32 %v896_v31, %v900_v32  ;;  %v1852_v31 = vld [vmem:[%s2498_s10 + $0x140] ss:$8 sps:$4 sm:$0xff]   ;;  %v1857_v32 = vld [vmem:[%s2498_s10 + $0x154] ss:$8 sps:$4 sm:$0xff]  }
 0x394   :  { %v907_v35 = vadd.f32 0.8, %v903_v33  ;;  %v1855_v33 = vld [vmem:[%s2498_s10 + $0x150] ss:$8 sps:$4 sm:$0xff]  }
 0x395   :  { %v908_v36 = vadd.f32 0.8, %v904_v34  ;;  %v1860_v34 = vld [vmem:[%s2498_s10 + $0x164] ss:$8 sps:$4 sm:$0xff]  }
 0x396   :  { %1896 = vrsqrt.f32 %v907_v35  ;;  %v1858_v35 = vld [vmem:[%s2498_s10 + $0x160] ss:$8 sps:$4 sm:$0xff]  }
 0x397   :  { %1898 = vrsqrt.f32 %v908_v36  ;;  %v1863_v36 = vld [vmem:[%s2498_s10 + $0x174] ss:$8 sps:$4 sm:$0xff]  }
 0x3a0   :  { %v1897_v37 = vpop.eup %1896 }
 0x3a1   :  { %v1899_v38 = vpop.eup %1898 }
 0x3a2   :  { %v918_v39 = vcombine.low %v1897_v37, %v1899_v38  ;;  %v1861_v37 = vld [vmem:[%s2498_s10 + $0x170] ss:$8 sps:$4 sm:$0xff]   ;;  %v1866_v38 = vld [vmem:[%s2498_s10 + $0x184] ss:$8 sps:$4 sm:$0xff]  }
 0x3a4   :  { %v932_v44 = vrot.slane %v918_v39, %v2113_v42  ;;  %v1864_v39 = vld [vmem:[%s2498_s10 + $0x180] ss:$8 sps:$4 sm:$0xff]  }
 0x3a6   :  { %v933_v46 = vcombine.low %v925_v41, %v932_v44  ;;  %v1869_v41 = vld [vmem:[%s2498_s10 + $0x194] ss:$8 sps:$4 sm:$0xff]   ;;  %v1867_v44 = vld [vmem:[%s2498_s10 + $0x190] ss:$8 sps:$4 sm:$0xff]  }
 0x3a8   :  { %v940_v49 = vrot.slane %v933_v46, %v2113_v42  ;;  %v1872_v46 = vld [vmem:[%s2498_s10 + $0x1a4] ss:$8 sps:$4 sm:$0xff]  }
 0x3aa   :  { %v942_v52 = vmul.f32 %v940_v49, %v835_v12  ;;  %v1870_v12 = vld [vmem:[%s2498_s10 + $0x1a0] ss:$8 sps:$4 sm:$0xff]   ;;  %v1875_v49 = vld [vmem:[%s2498_s10 + $0x1b4] ss:$8 sps:$4 sm:$0xff]  }
 0x3ac   :  { %v947_v53 = vrot.slane %v942_v52, %v2120_v47  ;;  %v951_v54 = vrot.slane %v942_v52, %v2123_v48  ;;  %v955_v55 = vrot.slane %v942_v52, %v954_v50  ;;  %v959_v56 = vrot.slane %v942_v52, %v958_v51  ;;  %v1876_v52 = vld [vmem:[%s2498_s10 + $0x1c0] ss:$8 sps:$4 sm:$0xff]  }
 0x3ae   :  { %v964_v57 = vmul.f32 %v947_v53, %v2344_v43  ;;  %v965_v60 = vmul.f32 %v951_v54, %v2346_v45  ;;  %v966_v62 = vmul.f32 %v955_v55, %v891_v26  ;;  %v967_v0 = vmul.f32 %v959_v56, %v892_v28  ;;  %v836_v43 = vld [vmem:[%s2500_s9] sm:$0xf]  ;;  %v1848_v26 = vld [vmem:[%s2498_s10 + $0x124] ss:$8 sps:$4 sm:$0xff]   ;;  %v1851_v28 = vld [vmem:[%s2498_s10 + $0x134] ss:$8 sps:$4 sm:$0xff]  }
 0x3af   :  { %v1001_v1 = vmul.f32 %v959_v56, %v830_v63  ;;  %v999_v2 = vmul.f32 %v951_v54, %v2334_v14  ;;  %v998_v61 = vmul.f32 %v947_v53, %v2329_v10  ;;  %v1000_v40 = vmul.f32 %v955_v55, %v2352_v58  ;;  %v1881_v53 = vld [vmem:[%s2498_s10 + $0x1d4] ss:$8 sps:$4 sm:$0xff]   ;;  %v1879_v54 = vld [vmem:[%s2498_s10 + $0x1d0] ss:$8 sps:$4 sm:$0xff]   ;;  %v1884_v55 = vld [vmem:[%s2498_s10 + $0x1e4] ss:$8 sps:$4 sm:$0xff]  }
 0x3b0   :  { %v972_v59 = vcombine.low %v964_v57, %v965_v60  ;;  %v973_v3 = vcombine.low %v966_v62, %v967_v0  ;;  %v1882_v56 = vld [vmem:[%s2498_s10 + $0x1e0] ss:$8 sps:$4 sm:$0xff]   ;;  %v1887_v57 = vld [vmem:[%s2498_s10 + $0x1f4] ss:$8 sps:$4 sm:$0xff]   ;;  %v1885_v62 = vld [vmem:[%s2498_s10 + $0x1f0] ss:$8 sps:$4 sm:$0xff]  }
 0x3b2   :  { %v980_v4 = vrot.slane %v972_v59, %v2113_v42  ;;  %v987_v5 = vrot.slane %v973_v3, %v2113_v42 }
 0x3b4   :  { %v988_v6 = vcombine.low %v980_v4, %v987_v5 }
 0x3b6   :  { %v995_v45 = vrot.slane %v988_v6, %v2113_v42 }
 0x3b8   :  { %v997_v63 = vsub.f32 %v836_v43, %v995_v45 }
 0x3ba   :  { %v1018_v7 = vrot.slane %v997_v63, %v958_v51  ;;  %v1010_v14 = vrot.slane %v997_v63, %v2123_v48  ;;  %v1006_v10 = vrot.slane %v997_v63, %v2120_v47  ;;  %v1014_v58 = vrot.slane %v997_v63, %v954_v50  ;;  %v1873_v50 = vld [vmem:[%s2498_s10 + $0x1b0] ss:$8 sps:$4 sm:$0xff]   ;;  %v1878_v51 = vld [vmem:[%s2498_s10 + $0x1c4] ss:$8 sps:$4 sm:$0xff]  }
 0x3bc   :  { %v1026_v8 = vadd.f32 %v1018_v7, %v1001_v1  ;;  %v1024_v9 = vadd.f32 %v1010_v14, %v999_v2  ;;  %v1023_v11 = vadd.f32 %v1006_v10, %v998_v61  ;;  %v2381_v13 = vadd.f32 %v1014_v58, %v1000_v40  ;;  %v1107_v2 = vld [vmem:[%s2501_s11] sm:$0x3] }
 0x3bd   :  { %v1112_v61 = vrot.slane %v1107_v2, %v2120_v47  ;;  %v1116_v40 = vrot.slane %v1107_v2, %v2123_v48 }
 0x3be   :  { %vm1028_vm7 = vcmp.gt.f32.partialorder %v1024_v9, 0.0  ;;  %v1032_v15 = vmul.f32 0.2, %v1024_v9  ;;  %vm1027_vm8 = vcmp.gt.f32.partialorder %v1023_v11, 0.0  ;;  %v1031_v16 = vmul.f32 0.2, %v1023_v11 }
 0x3bf   :  { %vm1030_vm9 = vcmp.gt.f32.partialorder %v1026_v8, 0.0  ;;  %v1034_v17 = vmul.f32 0.2, %v1026_v8  ;;  %v1033_v60 = vmul.f32 0.2, %v2381_v13  ;;  %vm1029_vm10 = vcmp.gt.f32.partialorder %v2381_v13, 0.0 }
 0x3c0   :  { %v1036_v18 = vsel %vm1028_vm7, %v1024_v9, %v1032_v15  ;;  %v1035_v42 = vsel %vm1027_vm8, %v1023_v11, %v1031_v16 }
 0x3c1   :  { %v1040_v19 = vpack.c.bf16 %v1036_v18, %v1036_v18  ;;  %v1039_v21 = vpack.c.bf16 %v1035_v42, %v1035_v42  ;;  %v1038_v22 = vsel %vm1030_vm9, %v1026_v8, %v1034_v17  ;;  %v1037_v0 = vsel %vm1029_vm10, %v2381_v13, %v1033_v60 }
 0x3c2   :  { %v1042_v24 = vpack.c.bf16 %v1038_v22, %v1038_v22  ;;  %v1041_v1 = vpack.c.bf16 %v1037_v0, %v1037_v0 }
 0x3c3   :  { %1471 = vmatprep.mubr.bf16.mxu0 %v1040_v19 }
 0x3c4   :  { %1472 = vmatmul.mubr.bf16.vlgmr.msra.gmra.mrb[8].mxu0 %v1039_v21 }
 0x3c5   :  { %1481 = vmatpush1.bf16.msra.mxu0 %v1840_v20  ;;  %1512 = vmatprep.mubr.bf16.mxu0 %v1042_v24 }
 0x3c6   :  { %1482 = vmatprep.subr.bf16.mxu0 %v1845_v23 }
 0x3c9   :  { %1483 = vmatpush1.bf16.msra.mxu0 %v1843_v25 }
 0x3ca   :  { %1484 = vmatprep.subr.bf16.mxu0 %v1848_v26 }
 0x3cd   :  { %1485 = vmatpush1.bf16.msra.mxu0 %v1846_v27 }
 0x3ce   :  { %1486 = vmatprep.subr.bf16.mxu0 %v1851_v28 }
 0x3d1   :  { %1487 = vmatpush1.bf16.msra.mxu0 %v1849_v29 }
 0x3d2   :  { %1488 = vmatprep.subr.bf16.mxu0 %v1854_v30 }
 0x3d5   :  { %1489 = vmatpush1.bf16.msra.mxu0 %v1852_v31 }
 0x3d6   :  { %1490 = vmatprep.subr.bf16.mxu0 %v1857_v32 }
 0x3d9   :  { %1491 = vmatpush1.bf16.msra.mxu0 %v1855_v33 }
 0x3da   :  { %1492 = vmatprep.subr.bf16.mxu0 %v1860_v34 }
 0x3dd   :  { %1493 = vmatpush1.bf16.msra.mxu0 %v1858_v35 }
 0x3de   :  { %1494 = vmatprep.subr.bf16.mxu0 %v1863_v36 }
 0x3e1   :  { %1495 = vmatpush1.bf16.msra.mxu0 %v1861_v37 }
 0x3e2   :  { %1496 = vmatprep.subr.bf16.mxu0 %v1866_v38 }
 0x3e5   :  { %1497 = vmatpush1.bf16.msra.mxu0 %v1864_v39 }
 0x3e6   :  { %1498 = vmatprep.subr.bf16.mxu0 %v1869_v41 }
 0x3e9   :  { %1499 = vmatpush1.bf16.msra.mxu0 %v1867_v44 }
 0x3ea   :  { %1500 = vmatprep.subr.bf16.mxu0 %v1872_v46 }
 0x3ed   :  { %1501 = vmatpush1.bf16.msra.mxu0 %v1870_v12 }
 0x3ee   :  { %1502 = vmatprep.subr.bf16.mxu0 %v1875_v49 }
 0x3f1   :  { %1503 = vmatpush1.bf16.msra.mxu0 %v1873_v50 }
 0x3f2   :  { %1504 = vmatprep.subr.bf16.mxu0 %v1878_v51 }
 0x3f5   :  { %1505 = vmatpush1.bf16.msra.mxu0 %v1876_v52 }
 0x3f6   :  { %1506 = vmatprep.subr.bf16.mxu0 %v1881_v53 }
 0x3f9   :  { %1507 = vmatpush1.bf16.msra.mxu0 %v1879_v54 }
 0x3fa   :  { %1508 = vmatprep.subr.bf16.mxu0 %v1884_v55 }
 0x3fd   :  { %1509 = vmatpush1.bf16.msra.mxu0 %v1882_v56 }
 0x3fe   :  { %1510 = vmatprep.subr.bf16.mxu0 %v1887_v57 }
 0x401   :  { %1511 = vmatpush1.bf16.msra.mxu0 %v1885_v62 }
 0x404   :  { %1513 = vmatmul.mubr.bf16.vlgmr.msra.gmra.mrb[8].mxu0 %v1041_v1 }
 0x4d7   :  { %v1514_v59 = vpop.f32.mrb[8].mxu0 }
 0x4d8   :  { %v1677_v3 = vadd.f32 %v1514_v59, %v1112_v61  ;;  %v1516_v4 = vpop.f32.mrb[9].mxu0 }
 0x4d9   :  { %v1678_v5 = vadd.f32 %v1516_v4, %v1116_v40  ;;  %v1518_v6 = vpop.f32.mrb[10].mxu0 }
 0x4da   :  { %1900 = vtanh.f32 %v1677_v3  ;;  %v1519_v43 = vpop.f32.mrb[11].mxu0 }
 0x4db   :  { %1902 = vtanh.f32 %v1678_v5 }
 0x4e4   :  { %v1901_v45 = vpop.eup %1900 }
 0x4e5   :  { %v1903_v63 = vpop.eup %1902  ;;  %1523 = vst [vmem:[%s2502_s12] sm:$0xff] %v1901_v45 }
 0x4e6   :  { %1524 = vst [vmem:[%s2502_s12 + $0x8] sm:$0xff] %v1903_v63 }

</bundles_post_ra>
